<compile_context>
chip_gen: v7x
topology: tpu7x:2x2x1
jax: 0.10.0
libtpu: 0.0.40
codegen_flags: <defaults>
</compile_context>

<pallas_src>
import functools

import jax
import jax.numpy as jnp
from jax.experimental import pallas as pl
from jax.experimental.pallas import tpu as pltpu


def _round_up(v, m):
    return ((v + m - 1) // m) * m


def _fancy_activation_kernel(x_ref, w_ref, y_ref, o_ref, *, eps):
    # x_ref: (TM, DIN)  w_ref: (DIN, DOUT)  y_ref: (TM, DOUT)  o_ref: (TM, DOUT)
    # Weighted average of the input history (MXU matmul, f32 accumulate), then clamp.
    c = jnp.dot(x_ref[...], w_ref[...], preferred_element_type=jnp.float32)
    c = jnp.clip(c, eps, 1.0 - eps)

    # n = -c/(c-1) = c/(1-c);  n/(n + exp(-y)) == c / (c + (1-c)*exp(-y)).
    # One exp + one divide per element (same overflow behaviour as the torch module).
    t = jnp.exp(-y_ref[...])
    o_ref[...] = (c / (c + (1.0 - c) * t)).astype(o_ref.dtype)


def fancy_activation_forward(x, y, skip_parameter, *, eps=0.005, tm=None):
    """x: [B, dim_in], y: [B, dim_out], skip_parameter: [dim_in, dim_out] -> [B, dim_out]."""
    B, dim_in = x.shape
    By, dim_out = y.shape
    assert By == B
    assert skip_parameter.shape == (dim_in, dim_out)

    # Hoist the column softmax of the tiny parameter out of the kernel (one-off, pure JAX).
    w_soft = jax.nn.softmax(skip_parameter.astype(jnp.float32), axis=0)

    # Batch tile selection (primary sweep lever).
    if tm is None:
        if B <= 512:
            tm = B                      # exact single tile: block dims == array dims (legal)
        else:
            tm = 1024                   # large-batch tile; amortizes ~0.35us/step overhead
            if pl.cdiv(B, tm) < 2:      # give v7x's 2 TensorCores >= 2 parallel grid steps
                tm = _round_up(pl.cdiv(B, 2), 8)
    tm = max(1, min(int(tm), B))
    if tm != B and tm % 8 != 0:
        tm = _round_up(tm, 8)           # sublane constraint unless the tile is the full batch

    grid = (pl.cdiv(B, tm),)

    out = pl.pallas_call(
        functools.partial(_fancy_activation_kernel, eps=float(eps)),
        out_shape=jax.ShapeDtypeStruct((B, dim_out), jnp.float32),
        grid_spec=pltpu.PrefetchScalarGridSpec(
            num_scalar_prefetch=0,
            grid=grid,
            in_specs=[
                pl.BlockSpec((tm, dim_in), lambda i: (i, 0)),       # x batch tile
                pl.BlockSpec((dim_in, dim_out), lambda i: (0, 0)),  # softmaxed weights (resident)
                pl.BlockSpec((tm, dim_out), lambda i: (i, 0)),      # y batch tile (native width)
            ],
            out_specs=pl.BlockSpec((tm, dim_out), lambda i: (i, 0)),
        ),
        compiler_params=pltpu.CompilerParams(
            dimension_semantics=("parallel",),  # shard grid steps across v7x's 2 TensorCores
        ),
    )(x.astype(jnp.float32), w_soft, y.astype(jnp.float32))

    return out


def reference_forward(x, y, skip_parameter, eps=0.005):
    w = jax.nn.softmax(skip_parameter, axis=0)
    xw = jnp.clip(x @ w, eps, 1.0 - eps)
    n = -xw / (xw - 1.0)
    return n / (n + jnp.exp(-y))


if __name__ == "__main__":
    dim_in, dim_out, B = 48, 12, 4   # shapes from the module docstring (small batch)

    key = jax.random.PRNGKey(0)
    kx, ky, kw = jax.random.split(key, 3)

    x = jax.random.uniform(kx, (B, dim_in), dtype=jnp.float32)           # last-4h PV generation
    y = jax.random.normal(ky, (B, dim_out), dtype=jnp.float32)           # transformer output
    skip_parameter = 0.1 * jax.random.normal(kw, (dim_in, dim_out), dtype=jnp.float32)

    out = fancy_activation_forward(x, y, skip_parameter)
    jax.block_until_ready(out)

    ref = reference_forward(x, y, skip_parameter)
    assert out.shape == (B, dim_out)
    assert jnp.allclose(out, ref, atol=1e-4, rtol=1e-4), "mismatch vs reference"
    assert bool(jnp.all((out > 0.0) & (out < 1.0))), "output not in (0, 1)"

    print("KERNEL_OK")
</pallas_src>

<mosaic_0001>
module attributes {stable_mosaic.version = 11 : i64} {
  func.func @_fancy_activation_kernel(%arg0: i32, %arg1: memref<4x48xf32, #tpu.memory_space<vmem>>, %arg2: memref<48x12xf32, #tpu.memory_space<vmem>>, %arg3: memref<4x12xf32, #tpu.memory_space<vmem>>, %arg4: memref<4x12xf32, #tpu.memory_space<vmem>>) attributes {dimension_semantics = [#tpu.dimension_semantics<parallel>], iteration_bounds = array<i64: 1>, scalar_prefetch = 0 : i64, scratch_operands = 0 : i64, tpu.core_type = #tpu.core_type<tc>, window_params = [{transform_indices = @transform_0, window_bounds = array<i64: 4, 48>}, {pipeline_mode = #tpu.pipeline_mode<synchronous>, transform_indices = @transform_1, window_bounds = array<i64: 48, 12>}, {transform_indices = @transform_2, window_bounds = array<i64: 4, 12>}, {transform_indices = @transform_3, window_bounds = array<i64: 4, 12>}]} {
    %c0 = arith.constant 0 : index
    %c0_0 = arith.constant 0 : index
    %0 = vector.load %arg1[%c0, %c0_0] : memref<4x48xf32, #tpu.memory_space<vmem>>, vector<4x48xf32>
    %c0_1 = arith.constant 0 : index
    %c0_2 = arith.constant 0 : index
    %1 = vector.load %arg2[%c0_1, %c0_2] : memref<48x12xf32, #tpu.memory_space<vmem>>, vector<48x12xf32>
    %cst = arith.constant dense<0.000000e+00> : vector<4x12xf32>
    %2 = tpu.matmul %0, %1, %cst {dimension_numbers = #tpu.dot_dimension_numbers<[1], [0], [0], [1], [0, 0, 1, 1], [], []>} : vector<4x48xf32>, vector<48x12xf32>, vector<4x12xf32> -> vector<4x12xf32>
    %cst_3 = arith.constant 5.000000e-03 : f32
    %cst_4 = arith.constant 9.950000e-01 : f32
    %3 = vector.broadcast %cst_3 : f32 to vector<4x12xf32>
    %4 = arith.maximumf %3, %2 : vector<4x12xf32>
    %5 = vector.broadcast %cst_4 : f32 to vector<4x12xf32>
    %6 = arith.minimumf %5, %4 : vector<4x12xf32>
    %c0_5 = arith.constant 0 : index
    %c0_6 = arith.constant 0 : index
    %7 = vector.load %arg3[%c0_5, %c0_6] : memref<4x12xf32, #tpu.memory_space<vmem>>, vector<4x12xf32>
    %cst_7 = arith.constant 0.000000e+00 : f32
    %8 = vector.broadcast %cst_7 : f32 to vector<4x12xf32>
    %9 = arith.subf %8, %7 : vector<4x12xf32>
    %10 = math.exp %9 : vector<4x12xf32>
    %cst_8 = arith.constant 1.000000e+00 : f32
    %11 = vector.broadcast %cst_8 : f32 to vector<4x12xf32>
    %12 = arith.subf %11, %6 : vector<4x12xf32>
    %13 = arith.mulf %12, %10 : vector<4x12xf32>
    %14 = arith.addf %6, %13 : vector<4x12xf32>
    %15 = arith.divf %6, %14 : vector<4x12xf32>
    %c0_9 = arith.constant 0 : index
    %c0_10 = arith.constant 0 : index
    %16 = vector.load %arg4[%c0_9, %c0_10] : memref<4x12xf32, #tpu.memory_space<vmem>>, vector<4x12xf32>
    tpu.vector_store %arg4[%c0_9, %c0_10], %15 {strides = array<i32>} : memref<4x12xf32, #tpu.memory_space<vmem>>, vector<4x12xf32>,
    return
  }
  func.func @transform_0(%arg0: i32) -> (i32, i32) {
    %c0_i32 = arith.constant 0 : i32
    %c0_i32_0 = arith.constant 0 : i32
    return %arg0, %c0_i32 : i32, i32
  }
  func.func @transform_1(%arg0: i32) -> (i32, i32) {
    %c0_i32 = arith.constant 0 : i32
    %c0_i32_0 = arith.constant 0 : i32
    %c0_i32_1 = arith.constant 0 : i32
    return %c0_i32, %c0_i32_0 : i32, i32
  }
  func.func @transform_2(%arg0: i32) -> (i32, i32) {
    %c0_i32 = arith.constant 0 : i32
    %c0_i32_0 = arith.constant 0 : i32
    return %arg0, %c0_i32 : i32, i32
  }
  func.func @transform_3(%arg0: i32) -> (i32, i32) {
    %c0_i32 = arith.constant 0 : i32
    %c0_i32_0 = arith.constant 0 : i32
    return %arg0, %c0_i32 : i32, i32
  }
}

</mosaic_0001>

<bundles_post_ra>
// kernel: tpu_custom_call.1
= control target key start
LH: loop header
LB: loop body
LE: loop exit
PB: predicated region body
PF: predicated region fallthrough
CT: control target
= control target key end

     0   :  { %v187_v3 = vmov 0.0|0.0   ;;  %vm188_vm0 = vmmov 0   ;;  %v189_v6 = vmov 0.0   ;;  %s247_s0 = inlined_call_operand.vmem [shape: f32[4,48], index: 0, kind: input, shape index: {}]   ;;  %s248_s1 = inlined_call_operand.vmem [shape: f32[48,12], index: 1, kind: input, shape index: {}]   ;;  %s249_s2 = inlined_call_operand.vmem [shape: f32[4,12], index: 2, kind: input, shape index: {}]   ;;  %s250_s3 = inlined_call_operand.hbm [shape: f32[4,12], index: 3, kind: output, shape index: {}]  }
   0x1   :  { %v16_v0 = vld [vmem:[%s248_s1] sm:$0xff]  ;;  %v17_v1 = vld [vmem:[%s248_s1 + $0x8] sm:$0xff]  ;;  %v18_v2 = vld [vmem:[%s248_s1 + $0x10] sm:$0xff]  ;;  %146 = vmatprep.subr.bf16.mxu0 %v187_v3  ;;  %143 = vmatprep.mubr.msk.f32.mxu0 %vm188_vm0, %v189_v6 }
   0x2   :  { %v147_v4 = vpack.c.bf16 %v17_v1, %v16_v0  ;;  %v19_v5 = vld [vmem:[%s248_s1 + $0x18] sm:$0xff] }
   0x3   :  { %8 = vsyncpa [#allocation3], 0  ;;  %v150_v7 = vpack.c.bf16 %v19_v5, %v18_v2  ;;  %v20_v8 = vld [vmem:[%s248_s1 + $0x20] sm:$0xff]  ;;  %v21_v9 = vld [vmem:[%s248_s1 + $0x28] sm:$0xff]  ;;  %vm22_vm1 = vcmask 392192   ;;  %s190_s1 = smov [#allocation2]  }
   0x4   :  { %148 = vmatpush3.bf16.msra.mxu0 %v147_v4  ;;  %v153_v10 = vpack.c.bf16 %v21_v9, %v20_v8  ;;  %v15_v11 = vld [vmem:[%s247_s0] sm:$0xf]  ;;  %s115_s0 = sshll.u32 %s190_s1, 4  ;;  %vm107_vm2 = vcmask 93184   ;;  %s116_s0 = int_to_ptr.vmem [resolvable:$true] %s115_s0 }
   0x5   :  { %149 = vmatprep.subr.bf16.mxu0 %v187_v3  ;;  %v98_v12 = vld [vmem:[%s249_s2] sm:$0xf]  ;;  %s163_s2 = scalar_lea.vmem %s116_s0, 64  ;;  %p168_p1 = scmp.lt.s32.totalorder %s116_s0, %s116_s0 }
   0x6   :  { %v99_v13 = vsub.f32 0.0, %v98_v12  ;;  %p164_p0 = scmp.ne.s32.totalorder %s116_s0, %s163_s2  ;;  %p169_p2 = scmp.lt.s32.totalorder %s163_s2, %s163_s2 }
   0x8   :  { %151 = vmatpush3.bf16.msra.mxu0 %v150_v7  ;;  %v100_v14 = vmul.f32 1.442695, %v99_v13  ;;  %p170_p3 = por %p169_p2, %p168_p1 }
   0x9   :  { %152 = vmatprep.subr.bf16.mxu0 %v187_v3 }
   0xa   :  { %159 = vpow2.f32 %v100_v14  ;;  %p171_p4 = pnand %p170_p3, %p164_p0 }
   0xc   :  { %154 = vmatpush3.bf16.msra.mxu0 %v153_v10 }
   0xf   :  { %144 = vmatmul.mubr.msk.f32.vlgmr.msra.gmra.mrb[0].mxu0 %vm22_vm1, %v15_v11 }
  0x14   :  { %v160_v19 = vpop.eup %159 }
  0xe2   :  { %v92_v15 = vpop.f32.mrb[0].mxu0 }
  0xe3   :  { %v96_v16 = vmax.f32 %v92_v15, 0.005  ;;  %v145_v17 = vpop.f32.mrb[1].mxu0 }
  0xe5   :  { %v97_v18 = vmin.f32 %v96_v16, 0.995 }
  0xe7   :  { %v102_v20 = vsub.f32 1.0, %v97_v18 }
  0xe9   :  { %v103_v21 = vmul.f32 %v160_v19, %v102_v20 }
  0xeb   :  { %v104_v22 = vadd.f32 %v103_v21, %v97_v18 }
  0xed   :  { %161 = vrcp.f32 %v104_v22 }
  0xf7   :  { %v162_v23 = vpop.eup %161 }
  0xf8   :  { %v106_v24 = vmul.f32 %v162_v23, %v97_v18 }
  0xfa   :  { %108 = vst.msk [vmem:[#allocation2] sm:$0xf] %vm107_vm2, %v106_v24 }
  0xfb   :  { %174 = shalt.err (!%p171_p4)
}
  0xfc   :  { %s175_s30 = scalar_lea.hbm %s250_s3, 64 }
  0xfd   :  { %p176_p5 = scmp.ne.s32.totalorder %s250_s3, %s175_s30  ;;  %p179_p6 = scmp.lt.u32.totalorder %s175_s30, %s250_s3 }
  0xff   :  { %p181_p7 = pnand %p179_p6, %p176_p5 }
 0x101   :  { %184 = shalt.err (!%p181_p7)
}
 0x102   :  { %118 = dma.vmem_to_hbm [thread:$0]  %s116_s0, 64, %s250_s3, [#allocation3]  }
 0x103   :  { %185 = dma.done.wait [#allocation3], 64  }
 0x104   :  { %186 = vsyncadd [#allocation3], 4294967232 }
 0x105   :  { %122 = vsyncpa [#allocation3], 1 }

</bundles_post_ra>
